<compile_context>
chip_gen: v6e
topology: v6e:2x2x1
jax: 0.10.0
libtpu: 0.0.40
codegen_flags: <defaults>
</compile_context>

<pallas_src>
import functools
import math

import jax
import jax.numpy as jnp
from jax import lax
from jax.experimental import pallas as pl
from jax.experimental.pallas import tpu as pltpu


def _round_up(x, m):
    return ((x + m - 1) // m) * m


# ----------------------------------------------------------------------------
# Pallas kernels
# ----------------------------------------------------------------------------

def _linear_kernel(x_ref, w_ref, b_ref, o_ref, *, relu):
    # x: (TM, Din), w: (Din, Dout), b: (1, Dout)
    y = jnp.dot(x_ref[...], w_ref[...], preferred_element_type=jnp.float32)
    y = y + b_ref[...]
    if relu:
        y = jnp.maximum(y, 0.0)
    o_ref[...] = y.astype(o_ref.dtype)


def linear(x, w, b, *, relu, block_rows=512):
    """Row-tiled x @ w + b (optional ReLU).  x: (rows, Din), w: (Din, Dout)."""
    rows, din = x.shape
    dout = w.shape[1]
    rows_p = _round_up(rows, 8)
    tm = min(block_rows, rows_p)
    rows_p = _round_up(rows_p, tm)
    if rows_p != rows:
        x = jnp.pad(x, ((0, rows_p - rows), (0, 0)))
    out = pl.pallas_call(
        functools.partial(_linear_kernel, relu=relu),
        out_shape=jax.ShapeDtypeStruct((rows_p, dout), jnp.float32),
        grid=(rows_p // tm,),
        in_specs=[
            pl.BlockSpec((tm, din), lambda i: (i, 0)),
            pl.BlockSpec((din, dout), lambda i: (0, 0)),   # resident weight
            pl.BlockSpec((1, dout), lambda i: (0, 0)),     # resident bias
        ],
        out_specs=pl.BlockSpec((tm, dout), lambda i: (i, 0)),
        compiler_params=pltpu.CompilerParams(dimension_semantics=("parallel",)),
    )(x, w, b.reshape(1, -1))
    return out[:rows] if rows_p != rows else out


def _head_kernel(x_ref, w1_ref, b1_ref, w2_ref, b2_ref, o_ref):
    # Fused Linear -> ReLU -> Linear; intermediate stays in vregs/VMEM.
    h = jnp.dot(x_ref[...], w1_ref[...], preferred_element_type=jnp.float32)
    h = jnp.maximum(h + b1_ref[...], 0.0)
    y = jnp.dot(h, w2_ref[...], preferred_element_type=jnp.float32) + b2_ref[...]
    o_ref[...] = y.astype(o_ref.dtype)


def fused_head(x, w1, b1, w2, b2, *, block_rows=512):
    rows, hp = x.shape
    ep = w1.shape[1]
    op = w2.shape[1]
    rows_p = _round_up(rows, 8)
    tm = min(block_rows, rows_p)
    rows_p = _round_up(rows_p, tm)
    if rows_p != rows:
        x = jnp.pad(x, ((0, rows_p - rows), (0, 0)))
    out = pl.pallas_call(
        _head_kernel,
        out_shape=jax.ShapeDtypeStruct((rows_p, op), jnp.float32),
        grid=(rows_p // tm,),
        in_specs=[
            pl.BlockSpec((tm, hp), lambda i: (i, 0)),
            pl.BlockSpec((hp, ep), lambda i: (0, 0)),
            pl.BlockSpec((1, ep), lambda i: (0, 0)),
            pl.BlockSpec((ep, op), lambda i: (0, 0)),
            pl.BlockSpec((1, op), lambda i: (0, 0)),
        ],
        out_specs=pl.BlockSpec((tm, op), lambda i: (i, 0)),
        compiler_params=pltpu.CompilerParams(dimension_semantics=("parallel",)),
    )(x, w1, b1.reshape(1, -1), w2, b2.reshape(1, -1))
    return out[:rows] if rows_p != rows else out


def _gru_rec_kernel(gi_ref, whh_ref, bhh_ref, h0_ref, y_ref, hT_ref, h_scr,
                    *, t_chunk, t_total, hp, needs_mask):
    # grid axis 0 = time chunks (sequential); hidden state carried in VMEM scratch.
    c = pl.program_id(0)

    @pl.when(c == 0)
    def _init():
        h_scr[...] = h0_ref[...]

    whh = whh_ref[...]
    bhh = bhh_ref[...]

    def step(i, h):
        gi = gi_ref[i]                                   # (Bp, 3*Hp), precomputed
        gh = jnp.dot(h, whh, preferred_element_type=jnp.float32) + bhh
        # PyTorch gate order: r, z, n.  Gates are lane-aligned Hp-wide blocks.
        r = jax.nn.sigmoid(gi[:, 0:hp] + gh[:, 0:hp])
        z = jax.nn.sigmoid(gi[:, hp:2 * hp] + gh[:, hp:2 * hp])
        n = jnp.tanh(gi[:, 2 * hp:3 * hp] + r * gh[:, 2 * hp:3 * hp])
        h_new = (1.0 - z) * n + z * h
        if needs_mask:
            # freeze the state on padded timesteps so hT stays correct
            h_new = jnp.where(c * t_chunk + i < t_total, h_new, h)
        y_ref[i] = h_new.astype(y_ref.dtype)
        return h_new

    h_final = lax.fori_loop(0, t_chunk, step, h_scr[...], unroll=True)
    h_scr[...] = h_final

    @pl.when(c == pl.num_programs(0) - 1)
    def _final():
        hT_ref[...] = h_final.astype(hT_ref.dtype)


def gru_recurrent(gi_tm, w_hh_p, b_hh_p, h0_p, *, t_total, t_chunk):
    """Recurrent part of one GRU layer.

    gi_tm:  (T_p, Bp, 3*Hp) precomputed x@W_ih + b_ih, time-major.
    Returns y (T_p, Bp, Hp) and final hidden (Bp, Hp).
    """
    T_p, Bp, three_hp = gi_tm.shape
    hp = three_hp // 3
    n_chunks = T_p // t_chunk
    y, hT = pl.pallas_call(
        functools.partial(_gru_rec_kernel, t_chunk=t_chunk, t_total=t_total,
                          hp=hp, needs_mask=(T_p != t_total)),
        out_shape=(jax.ShapeDtypeStruct((T_p, Bp, hp), jnp.float32),
                   jax.ShapeDtypeStruct((Bp, hp), jnp.float32)),
        grid=(n_chunks,),
        in_specs=[
            pl.BlockSpec((t_chunk, Bp, three_hp), lambda c: (c, 0, 0)),  # gi chunk
            pl.BlockSpec((hp, three_hp), lambda c: (0, 0)),              # W_hh^T resident
            pl.BlockSpec((1, three_hp), lambda c: (0, 0)),               # b_hh resident
            pl.BlockSpec((Bp, hp), lambda c: (0, 0)),                    # h0 resident
        ],
        out_specs=(
            pl.BlockSpec((t_chunk, Bp, hp), lambda c: (c, 0, 0)),        # y chunk
            pl.BlockSpec((Bp, hp), lambda c: (0, 0)),                    # final hidden
        ),
        scratch_shapes=[pltpu.VMEM((Bp, hp), jnp.float32)],
        compiler_params=pltpu.CompilerParams(dimension_semantics=("arbitrary",)),
    )(gi_tm, w_hh_p, b_hh_p.reshape(1, -1), h0_p)
    return y, hT


# ----------------------------------------------------------------------------
# Parameter init (deterministic, mirrors the shapes in GRU_plain.__init__)
# ----------------------------------------------------------------------------

def _xavier_uniform(key, shape, gain):
    # shape = (fan_out, fan_in) like a PyTorch Linear / GRU weight
    fan_out, fan_in = shape
    bound = gain * math.sqrt(6.0 / (fan_in + fan_out))
    return jax.random.uniform(key, shape, jnp.float32, -bound, bound)


def init_params(key, input_size, embedding_size, hidden_size, num_layers,
                output_size, has_input=True):
    gain_sigmoid = 1.0                 # nn.init.calculate_gain('sigmoid')
    gain_relu = math.sqrt(2.0)         # nn.init.calculate_gain('relu')
    keys = jax.random.split(key, 4 + 2 * num_layers)
    p = {}

    # self.input = nn.Linear(input_size, embedding_size)  (relu-gain xavier)
    p["in_w"] = _xavier_uniform(keys[0], (embedding_size, input_size), gain_relu).T
    p["in_b"] = jnp.zeros((embedding_size,), jnp.float32)

    # GRU weights: weight_ih_l{k}: (3H, Din), weight_hh_l{k}: (3H, H), biases = 0.25
    rnn_in = embedding_size if has_input else input_size
    for l in range(num_layers):
        din = rnn_in if l == 0 else hidden_size
        p[f"w_ih_{l}"] = _xavier_uniform(keys[2 + 2 * l], (3 * hidden_size, din),
                                         gain_sigmoid).T          # stored (Din, 3H)
        p[f"w_hh_{l}"] = _xavier_uniform(keys[3 + 2 * l], (3 * hidden_size, hidden_size),
                                         gain_sigmoid).T          # stored (H, 3H)
        p[f"b_ih_{l}"] = jnp.full((3 * hidden_size,), 0.25, jnp.float32)
        p[f"b_hh_{l}"] = jnp.full((3 * hidden_size,), 0.25, jnp.float32)

    # self.output = Sequential(Linear(H, E), ReLU, Linear(E, out))  (relu-gain xavier)
    p["out1_w"] = _xavier_uniform(keys[1], (embedding_size, hidden_size), gain_relu).T
    p["out1_b"] = jnp.zeros((embedding_size,), jnp.float32)
    p["out2_w"] = _xavier_uniform(keys[-1], (output_size, embedding_size), gain_relu).T
    p["out2_b"] = jnp.zeros((output_size,), jnp.float32)
    return p


# ----------------------------------------------------------------------------
# Padding helpers (zero-padding keeps the math exact; padded lanes stay 0)
# ----------------------------------------------------------------------------

def _pad2(w, r_p, c_p):
    r, c = w.shape
    return jnp.pad(w, ((0, r_p - r), (0, c_p - c)))


def _pad_gate_weight(w_t, din_p, hp):
    # w_t: (Din, 3H) transposed GRU weight; returns (din_p, 3*hp) with each of
    # the 3 gates occupying its own lane-aligned hp-wide column block.
    din, three_h = w_t.shape
    h = three_h // 3
    w = w_t.reshape(din, 3, h)
    w = jnp.pad(w, ((0, din_p - din), (0, 0), (0, hp - h)))
    return w.reshape(din_p, 3 * hp)


def _pad_gate_bias(b, hp):
    h = b.shape[0] // 3
    b = b.reshape(3, h)
    b = jnp.pad(b, ((0, 0), (0, hp - h)))
    return b.reshape(3 * hp)


# ----------------------------------------------------------------------------
# Forward (GRU_plain.forward with pack=False; hidden starts at zeros)
# ----------------------------------------------------------------------------

def gru_plain_forward(params, input_raw, *, num_layers, hidden_size,
                      embedding_size, output_size, has_input=True,
                      has_output=True, hidden=None, time_chunk=32):
    B, T, in_size = input_raw.shape
    H = hidden_size
    Hp = _round_up(H, 128)
    Bp = _round_up(B, 8)
    Ep = _round_up(embedding_size, 128)
    Op = _round_up(output_size, 128) if has_output else None
    TC = min(T, time_chunk)
    T_p = _round_up(T, TC)

    # pad batch/time, go time-major and flatten rows for the batched matmuls
    x = jnp.pad(input_raw.astype(jnp.float32),
                ((0, Bp - B), (0, T_p - T), (0, 0)))
    x_tm = jnp.transpose(x, (1, 0, 2)).reshape(T_p * Bp, in_size)

    if has_input:
        in_w = _pad2(params["in_w"], in_size, Ep)
        in_b = jnp.pad(params["in_b"], (0, Ep - embedding_size))
        layer_in = linear(x_tm, in_w, in_b, relu=True)          # (T_p*Bp, Ep)
        d_in = Ep
    else:
        layer_in = x_tm
        d_in = in_size

    if hidden is None:
        hidden = jnp.zeros((num_layers, B, H), jnp.float32)
    hidden_p = jnp.pad(hidden, ((0, 0), (0, Bp - B), (0, Hp - H)))

    h_finals = []
    for l in range(num_layers):
        w_ih = _pad_gate_weight(params[f"w_ih_{l}"], d_in, Hp)   # (d_in, 3Hp)
        b_ih = _pad_gate_bias(params[f"b_ih_{l}"], Hp)
        w_hh = _pad_gate_weight(params[f"w_hh_{l}"], Hp, Hp)     # (Hp, 3Hp)
        b_hh = _pad_gate_bias(params[f"b_hh_{l}"], Hp)

        # input projection hoisted out of the time loop: one big matmul
        gi = linear(layer_in, w_ih, b_ih, relu=False)            # (T_p*Bp, 3Hp)
        gi = gi.reshape(T_p, Bp, 3 * Hp)

        y, hT = gru_recurrent(gi, w_hh, b_hh, hidden_p[l],
                              t_total=T, t_chunk=TC)
        h_finals.append(hT[:B, :H])
        layer_in = y.reshape(T_p * Bp, Hp)
        d_in = Hp

    new_hidden = jnp.stack(h_finals, axis=0)                     # (L, B, H)

    if has_output:
        w1 = _pad2(params["out1_w"], Hp, Ep)
        b1 = jnp.pad(params["out1_b"], (0, Ep - embedding_size))
        w2 = _pad2(params["out2_w"], Ep, Op)
        b2 = jnp.pad(params["out2_b"], (0, Op - output_size))
        o = fused_head(layer_in, w1, b1, w2, b2)                 # (T_p*Bp, Op)
        o = o.reshape(T_p, Bp, Op).transpose(1, 0, 2)[:B, :T, :output_size]
        return o, new_hidden

    y_b = layer_in.reshape(T_p, Bp, Hp).transpose(1, 0, 2)[:B, :T, :H]
    return y_b, new_hidden


# ----------------------------------------------------------------------------
# Demo
# ----------------------------------------------------------------------------

if __name__ == "__main__":
    input_size = 4
    embedding_size = 16
    hidden_size = 32
    num_layers = 2
    output_size = 8
    B, T = 2, 8

    key = jax.random.PRNGKey(0)
    pkey, xkey = jax.random.split(key)
    params = init_params(pkey, input_size, embedding_size, hidden_size,
                         num_layers, output_size, has_input=True)
    x = jax.random.normal(xkey, (B, T, input_size), jnp.float32)

    out, hidden = gru_plain_forward(params, x,
                                    num_layers=num_layers,
                                    hidden_size=hidden_size,
                                    embedding_size=embedding_size,
                                    output_size=output_size,
                                    has_input=True, has_output=True)
    jax.block_until_ready((out, hidden))
    assert out.shape == (B, T, output_size)
    assert hidden.shape == (num_layers, B, hidden_size)
    assert bool(jnp.all(jnp.isfinite(out))) and bool(jnp.all(jnp.isfinite(hidden)))
    print("KERNEL_OK")
</pallas_src>

<mosaic_0001>
module attributes {stable_mosaic.version = 11 : i64} {
  func.func @_linear_kernel(%arg0: i32, %arg1: memref<64x4xf32, #tpu.memory_space<vmem>>, %arg2: memref<4x128xf32, #tpu.memory_space<vmem>>, %arg3: memref<1x128xf32, #tpu.memory_space<vmem>>, %arg4: memref<64x128xf32, #tpu.memory_space<vmem>>) attributes {dimension_semantics = [#tpu.dimension_semantics<parallel>], iteration_bounds = array<i64: 1>, scalar_prefetch = 0 : i64, scratch_operands = 0 : i64, tpu.core_type = #tpu.core_type<tc>, window_params = [{transform_indices = @transform_0, window_bounds = array<i64: 64, 4>}, {pipeline_mode = #tpu.pipeline_mode<synchronous>, transform_indices = @transform_1, window_bounds = array<i64: 4, 128>}, {pipeline_mode = #tpu.pipeline_mode<synchronous>, transform_indices = @transform_2, window_bounds = array<i64: 1, 128>}, {transform_indices = @transform_3, window_bounds = array<i64: 64, 128>}]} {
    %c0 = arith.constant 0 : index
    %c0_0 = arith.constant 0 : index
    %0 = vector.load %arg1[%c0, %c0_0] : memref<64x4xf32, #tpu.memory_space<vmem>>, vector<64x4xf32>
    %c0_1 = arith.constant 0 : index
    %c0_2 = arith.constant 0 : index
    %1 = vector.load %arg2[%c0_1, %c0_2] : memref<4x128xf32, #tpu.memory_space<vmem>>, vector<4x128xf32>
    %cst = arith.constant dense<0.000000e+00> : vector<64x128xf32>
    %2 = tpu.matmul %0, %1, %cst {dimension_numbers = #tpu.dot_dimension_numbers<[1], [0], [0], [1], [0, 0, 1, 1], [], []>} : vector<64x4xf32>, vector<4x128xf32>, vector<64x128xf32> -> vector<64x128xf32>
    %c0_3 = arith.constant 0 : index
    %c0_4 = arith.constant 0 : index
    %3 = vector.load %arg3[%c0_3, %c0_4] : memref<1x128xf32, #tpu.memory_space<vmem>>, vector<1x128xf32>
    %4 = vector.broadcast %3 : vector<1x128xf32> to vector<64x128xf32>
    %5 = arith.addf %2, %4 : vector<64x128xf32>
    %cst_5 = arith.constant 0.000000e+00 : f32
    %6 = vector.broadcast %cst_5 : f32 to vector<64x128xf32>
    %7 = arith.maximumf %5, %6 : vector<64x128xf32>
    %c0_6 = arith.constant 0 : index
    %c0_7 = arith.constant 0 : index
    %8 = vector.load %arg4[%c0_6, %c0_7] : memref<64x128xf32, #tpu.memory_space<vmem>>, vector<64x128xf32>
    tpu.vector_store %arg4[%c0_6, %c0_7], %7 {strides = array<i32>} : memref<64x128xf32, #tpu.memory_space<vmem>>, vector<64x128xf32>,
    return
  }
  func.func @transform_0(%arg0: i32) -> (i32, i32) {
    %c0_i32 = arith.constant 0 : i32
    %c0_i32_0 = arith.constant 0 : i32
    return %arg0, %c0_i32 : i32, i32
  }
  func.func @transform_1(%arg0: i32) -> (i32, i32) {
    %c0_i32 = arith.constant 0 : i32
    %c0_i32_0 = arith.constant 0 : i32
    %c0_i32_1 = arith.constant 0 : i32
    return %c0_i32, %c0_i32_0 : i32, i32
  }
  func.func @transform_2(%arg0: i32) -> (i32, i32) {
    %c0_i32 = arith.constant 0 : i32
    %c0_i32_0 = arith.constant 0 : i32
    %c0_i32_1 = arith.constant 0 : i32
    return %c0_i32, %c0_i32_0 : i32, i32
  }
  func.func @transform_3(%arg0: i32) -> (i32, i32) {
    %c0_i32 = arith.constant 0 : i32
    %c0_i32_0 = arith.constant 0 : i32
    return %arg0, %c0_i32 : i32, i32
  }
}

</mosaic_0001>

<bundles_post_ra>
// kernel: tpu_custom_call.1
= control target key start
LH: loop header
LB: loop body
LE: loop exit
PB: predicated region body
PF: predicated region fallthrough
CT: control target
= control target key end

     0   :  { %vm56_vm0 = vcmask 1043456   ;;  %vm31_vm1 = vcmask 31744   ;;  %s321_s0 = inlined_call_operand.vmem [shape: f32[64,4], index: 0, kind: input, shape index: {}]   ;;  %s322_s1 = inlined_call_operand.vmem [shape: f32[4,128], index: 1, kind: input, shape index: {}]   ;;  %s323_s2 = inlined_call_operand.vmem [shape: f32[1,128], index: 2, kind: input, shape index: {}]   ;;  %s324_s3 = inlined_call_operand.hbm [shape: f32[64,128], index: 3, kind: output, shape index: {}]  }
   0x1   :  { %v23_v0 = vld [vmem:[%s322_s1] sm:$0xf]  ;;  %v16_v3 = vld [vmem:[%s321_s0 + $0x8] sm:$0xff]  ;;  %v17_v5 = vld [vmem:[%s321_s0 + $0x10] sm:$0xff] }
   0x2   :  { %v15_v1 = vld [vmem:[%s321_s0] sm:$0xff]  ;;  %216 = vmatprep.subr.msk.mxu0 %vm56_vm0, %v23_v0  ;;  %230 = vmatprep.subr.msk.mxu1 %vm56_vm0, %v23_v0  ;;  %v20_v4 = vld [vmem:[%s321_s0 + $0x28] sm:$0xff]  ;;  %v21_v6 = vld [vmem:[%s321_s0 + $0x30] sm:$0xff] }
   0x3   :  { %v19_v2 = vld [vmem:[%s321_s0 + $0x20] sm:$0xff]  ;;  %217 = vmatpush3.msk.msra.mxu0 %vm56_vm0, %v23_v0  ;;  %231 = vmatpush3.msk.msra.mxu1 %vm56_vm0, %v23_v0 }
   0x4   :  { %218 = vmatprep.mubr.msk.f32.mxu0 %vm31_vm1, %v15_v1  ;;  %224 = vmatprep.mubr.msk.f32.mxu1 %vm31_vm1, %v19_v2 }
   0x5   :  { %8 = vsyncpa [#allocation3], 0  ;;  %219 = vmatmul.mubr.msk.f32.vlgmr.msra.gmra.mxu0 %vm31_vm1, %v16_v3  ;;  %225 = vmatmul.mubr.msk.f32.vlgmr.msra.gmra.mxu1 %vm31_vm1, %v20_v4  ;;  %v18_v7 = vld [vmem:[%s321_s0 + $0x18] sm:$0xff]  ;;  %v197_v9 = vld [vmem:[%s323_s2] ss:$0 sm:$0xff] }
   0x6   :  { %221 = vmatprep.mubr.msk.f32.mxu0 %vm31_vm1, %v17_v5  ;;  %227 = vmatprep.mubr.msk.f32.mxu1 %vm31_vm1, %v21_v6  ;;  %v22_v8 = vld [vmem:[%s321_s0 + $0x38] sm:$0xff]  ;;  %s257_s0 = smov [#allocation2]  }
   0x7   :  { %s186_s2 = sshll.u32 %s257_s0, 4  ;;  %s187_s2 = int_to_ptr.vmem [resolvable:$true] %s186_s2 }
   0x8   :  { %s235_s4 = scalar_lea.vmem %s187_s2, 1024  ;;  %p240_p1 = scmp.lt.s32.totalorder %s187_s2, %s187_s2 }
   0x9   :  { %222 = vmatmul.mubr.msk.f32.gmra.mxu0 %vm31_vm1, %v18_v7  ;;  %228 = vmatmul.mubr.msk.f32.gmra.mxu1 %vm31_vm1, %v22_v8  ;;  %p236_p0 = scmp.ne.s32.totalorder %s187_s2, %s235_s4  ;;  %p241_p2 = scmp.lt.s32.totalorder %s235_s4, %s235_s4 }
   0xb   :  { %p242_p3 = por %p241_p2, %p240_p1 }
   0xd   :  { %p243_p4 = pnand %p242_p3, %p236_p0 }
  0xc5   :  { %v220_v10 = vpop.f32.mrf.mxu0  ;;  %v226_v11 = vpop.f32.mrf.mxu1 }
  0xc6   :  { %v132_v12 = vadd.f32 %v220_v10, %v197_v9  ;;  %v152_v13 = vadd.f32 %v226_v11, %v197_v9 }
  0xc7   :  { %v126_v14 = vpop.f32.mrf.mxu0  ;;  %v146_v15 = vpop.f32.mrf.mxu1 }
  0xc8   :  { %v166_v16 = vmax.f32 %v132_v12, 0.0  ;;  %v170_v17 = vmax.f32 %v152_v13, 0.0  ;;  %v127_v18 = vadd.f32 %v197_v9, %v126_v14  ;;  %v147_v19 = vadd.f32 %v197_v9, %v146_v15 }
  0xc9   :  { %v223_v20 = vpop.f32.mrf.mxu0  ;;  %v229_v21 = vpop.f32.mrf.mxu1 }
  0xca   :  { %174 = vst [vmem:[#allocation2 + $0x8] sm:$0xff] %v166_v16  ;;  %178 = vst [vmem:[#allocation2 + $0x28] sm:$0xff] %v170_v17  ;;  %v165_v22 = vmax.f32 %v127_v18, 0.0  ;;  %v169_v23 = vmax.f32 %v147_v19, 0.0  ;;  %v142_v24 = vadd.f32 %v223_v20, %v197_v9  ;;  %v162_v25 = vadd.f32 %v229_v21, %v197_v9 }
  0xcb   :  { %v136_v26 = vpop.f32.mrf.mxu0  ;;  %v156_v27 = vpop.f32.mrf.mxu1 }
  0xcc   :  { %173 = vst [vmem:[#allocation2] sm:$0xff] %v165_v22  ;;  %177 = vst [vmem:[#allocation2 + $0x20] sm:$0xff] %v169_v23  ;;  %v168_v28 = vmax.f32 %v142_v24, 0.0  ;;  %v172_v29 = vmax.f32 %v162_v25, 0.0  ;;  %v137_v30 = vadd.f32 %v197_v9, %v136_v26  ;;  %v157_v31 = vadd.f32 %v197_v9, %v156_v27 }
  0xce   :  { %176 = vst [vmem:[#allocation2 + $0x18] sm:$0xff] %v168_v28  ;;  %180 = vst [vmem:[#allocation2 + $0x38] sm:$0xff] %v172_v29  ;;  %v167_v32 = vmax.f32 %v137_v30, 0.0  ;;  %v171_v33 = vmax.f32 %v157_v31, 0.0 }
  0xd0   :  { %175 = vst [vmem:[#allocation2 + $0x10] sm:$0xff] %v167_v32  ;;  %179 = vst [vmem:[#allocation2 + $0x30] sm:$0xff] %v171_v33 }
  0xd1   :  { %246 = shalt.err (!%p243_p4)
}
  0xd2   :  { %s258_s5 = smov 128   ;;  %s259_s6 = smov 8  }
  0xd3   :  { %192 = dma.vmem_to_hbm [thread:$0]  %s187_s2, 1024, %s324_s3, [#allocation3], %s258_s5, %s258_s5, %s259_s6  }
  0xd4   :  { %255 = dma.done.wait [#allocation3], 1024  }
  0xd5   :  { %256 = vsyncadd [#allocation3], 4294966272 }
  0xd6   :  { %196 = vsyncpa [#allocation3], 1 }

</bundles_post_ra>
